<compile_context>
chip_gen: v7x
topology: tpu7x:2x2x1
jax: 0.10.0
libtpu: 0.0.40
codegen_flags: <defaults>
</compile_context>

<pallas_src>
import functools

import jax
import jax.numpy as jnp
import numpy as np
from jax.experimental import pallas as pl
from jax.experimental.pallas import tpu as pltpu  # noqa: F401  (no scratch needed at these sizes)

PAD = 0

# Small model dims consistent with the module's config.
V = 128   # n_tgt_vocab
E = 32    # d_word_vec  (input_size)
H = 32    # d_model     (hidden_size)
B = 2     # batch
T = 8     # sequence length
BP = 8    # batch rows padded to one full sublane group


def _gru_lm_kernel(ids_ref, w_gi_ref, b_ih_ref, w_hh_t_ref, b_hh_ref,
                   w_lin_t_ref, b_lin_ref, w_emb_t_ref, out_ref,
                   *, seq_len, batch_padded):
    TBP = seq_len * batch_padded
    V_ = w_gi_ref.shape[0]
    H_ = w_hh_t_ref.shape[0]

    # ---- fused embedding gather + input gates: onehot(ids) @ (W_emb @ W_ih^T)
    # NOTE: ids outside [0, V) produce an all-zero one-hot row (PAD-like),
    # whereas jnp.take would clamp; inputs here are always in range.
    ids = ids_ref[...]                                           # (TBP, 1) int32
    col = jax.lax.broadcasted_iota(jnp.int32, (TBP, V_), 1)
    onehot = (col == ids).astype(jnp.float32)                    # (TBP, V)
    gi_all = (jnp.dot(onehot, w_gi_ref[...],
                      preferred_element_type=jnp.float32)
              + b_ih_ref[...])                                   # (TBP, 3H)

    b_hh = b_hh_ref[...]                                         # (1, 3H)
    # Fold b_hr, b_hz into the precomputed gates (loop-invariant); b_hn must
    # stay inside r * (W_hn h + b_hn) per PyTorch GRUCell semantics.
    gi_rz = gi_all[:, :2 * H_] + b_hh[:, :2 * H_]                # (TBP, 2H)
    gi_n = gi_all[:, 2 * H_:]                                    # (TBP, H)
    b_hn = jnp.broadcast_to(b_hh[:, 2 * H_:], (batch_padded, H_))  # hoisted once

    w_hh_t = w_hh_t_ref[...]                                     # (H, 3H)

    # ---- sequential GRU recurrence, fully unrolled (gate order r, z, n) ----
    # Hidden states stay in vregs; every per-step slice is a whole 8-row
    # sublane group (lo is a multiple of 8), so no masked / shifted accesses.
    h = jnp.zeros((batch_padded, H_), jnp.float32)
    h_steps = []
    for t in range(seq_len):                                     # static unroll
        lo = t * batch_padded
        hi = lo + batch_padded
        gh = jnp.dot(h, w_hh_t, preferred_element_type=jnp.float32)  # (BP, 3H)
        rz = jax.nn.sigmoid(gi_rz[lo:hi, :] + gh[:, :2 * H_])
        r = rz[:, :H_]
        z = rz[:, H_:]
        n = jnp.tanh(gi_n[lo:hi, :] + r * (gh[:, 2 * H_:] + b_hn))
        h = (1.0 - z) * n + z * h
        h_steps.append(h)                                        # lives in vregs

    hid = jnp.concatenate(h_steps, axis=0)                       # (TBP, H)

    # ---- linear_hidden + tanh (dropout = identity) -------------------------
    logits = jnp.tanh(jnp.dot(hid, w_lin_t_ref[...],
                              preferred_element_type=jnp.float32)
                      + b_lin_ref[...])                          # (TBP, E)

    # ---- generator: tied projection (pre-transposed), PAD mask, log_softmax
    scores = jnp.dot(logits, w_emb_t_ref[...],
                     preferred_element_type=jnp.float32)         # (TBP, V)
    vcol = jax.lax.broadcasted_iota(jnp.int32, scores.shape, 1)
    scores = jnp.where(vcol == PAD, -jnp.inf, scores)
    m = jnp.max(scores, axis=-1, keepdims=True)
    lse = jnp.log(jnp.sum(jnp.exp(scores - m), axis=-1, keepdims=True)) + m
    out_ref[...] = scores - lse                                  # dense (64,128) store


def disentangle_rnnlm_forward(tgt_seq, params):
    """tgt_seq: (B, T) int32 -> log_probs (B, T, V) float32."""
    bsz, tlen = tgt_seq.shape
    w_emb = params["w_emb"].astype(jnp.float32)
    vsz, esz = w_emb.shape
    hsz = params["w_hh"].shape[1]

    # Time-major token ids, each timestep padded to a full 8-row sublane group
    # (pad rows use PAD; their bounded garbage is dropped after the kernel).
    ids_tb = jnp.transpose(tgt_seq).astype(jnp.int32)            # (T, B)
    ids_pad = jnp.full((tlen, BP), PAD, jnp.int32).at[:, :bsz].set(ids_tb)
    ids_flat = ids_pad.reshape(tlen * BP, 1)

    # Fused embedding->gate weight: W_gi = W_emb @ W_ih^T  (exact: the one-hot
    # gather then selects a row of this product, same contraction as emb@W_ih^T).
    w_gi = jnp.dot(w_emb, params["w_ih"].T,
                   precision=jax.lax.Precision.HIGHEST)          # (V, 3H)

    args = (
        ids_flat,                          # (T*8, 1) int32
        w_gi,                              # (V, 3H) fused embedding + input gates
        params["b_ih"].reshape(1, -1),     # (1, 3H)
        params["w_hh"].T,                  # (H, 3H)
        params["b_hh"].reshape(1, -1),     # (1, 3H)
        params["w_lin"].T,                 # (H, E)
        params["b_lin"].reshape(1, -1),    # (1, E)
        w_emb.T,                           # (E, V)  pre-transposed tied generator
    )

    kernel = functools.partial(_gru_lm_kernel, seq_len=tlen, batch_padded=BP)

    # No grid, no index_maps, no scratch: whole arrays live in VMEM
    # (~100 KiB total), single kernel invocation.
    out_flat = pl.pallas_call(
        kernel,
        out_shape=jax.ShapeDtypeStruct((tlen * BP, vsz), jnp.float32),
    )(*args)

    # Drop batch-pad rows and return PyTorch's (B, T, V) layout.
    return jnp.transpose(out_flat.reshape(tlen, BP, vsz)[:, :bsz, :], (1, 0, 2))


def reference_forward(tgt_seq, params):
    """Pure-JAX reference with identical math, for a correctness check."""
    w_emb = params["w_emb"]
    emb = jnp.take(w_emb, tgt_seq, axis=0)                        # (B, T, E)

    def step(h, x_t):
        gi = x_t @ params["w_ih"].T + params["b_ih"]
        gh = h @ params["w_hh"].T + params["b_hh"]
        r = jax.nn.sigmoid(gi[:, :H] + gh[:, :H])
        z = jax.nn.sigmoid(gi[:, H:2 * H] + gh[:, H:2 * H])
        n = jnp.tanh(gi[:, 2 * H:] + r * gh[:, 2 * H:])
        h_new = (1.0 - z) * n + z * h
        return h_new, h_new

    h0 = jnp.zeros((tgt_seq.shape[0], H), jnp.float32)
    _, hs = jax.lax.scan(step, h0, jnp.transpose(emb, (1, 0, 2)))
    hs = jnp.transpose(hs, (1, 0, 2))                             # (B, T, H)
    logits = jnp.tanh(hs @ params["w_lin"].T + params["b_lin"])
    scores = logits @ w_emb.T
    scores = scores.at[..., PAD].set(-jnp.inf)
    return jax.nn.log_softmax(scores, axis=-1)


if __name__ == "__main__":
    key = jax.random.PRNGKey(0)
    ks = jax.random.split(key, 8)

    w_emb = jax.random.normal(ks[0], (V, E), jnp.float32) * 0.1
    w_emb = w_emb.at[PAD].set(0.0)      # nn.Embedding(padding_idx=PAD)

    params = {
        "w_emb": w_emb,                                                   # (V, E), tied with generator
        "w_ih":  jax.random.normal(ks[1], (3 * H, E), jnp.float32) * 0.1, # GRU W_ih
        "b_ih":  jax.random.normal(ks[2], (3 * H,), jnp.float32) * 0.1,
        "w_hh":  jax.random.normal(ks[3], (3 * H, H), jnp.float32) * 0.1, # GRU W_hh
        "b_hh":  jax.random.normal(ks[4], (3 * H,), jnp.float32) * 0.1,
        "w_lin": jax.random.normal(ks[5], (E, H), jnp.float32) * 0.1,     # linear_hidden
        "b_lin": jax.random.normal(ks[6], (E,), jnp.float32) * 0.1,
    }

    tgt_seq = jax.random.randint(ks[7], (B, T), 0, V, dtype=jnp.int32)

    fwd = jax.jit(disentangle_rnnlm_forward)
    out = fwd(tgt_seq, params)
    out = jax.block_until_ready(out)

    ref = reference_forward(tgt_seq, params)
    if not np.allclose(np.asarray(out), np.asarray(ref), atol=1e-4, rtol=1e-4):
        raise AssertionError("Pallas kernel does not match reference")

    print("KERNEL_OK")
</pallas_src>

<mosaic_0001>
module attributes {stable_mosaic.version = 11 : i64} {
  func.func @_gru_lm_kernel(%arg0: memref<64x1xi32, #tpu.memory_space<vmem>>, %arg1: memref<128x96xf32, #tpu.memory_space<vmem>>, %arg2: memref<1x96xf32, #tpu.memory_space<vmem>>, %arg3: memref<32x96xf32, #tpu.memory_space<vmem>>, %arg4: memref<1x96xf32, #tpu.memory_space<vmem>>, %arg5: memref<32x32xf32, #tpu.memory_space<vmem>>, %arg6: memref<1x32xf32, #tpu.memory_space<vmem>>, %arg7: memref<32x128xf32, #tpu.memory_space<vmem>>, %arg8: memref<64x128xf32, #tpu.memory_space<vmem>>) attributes {dimension_semantics = [], scalar_prefetch = 0 : i64, scratch_operands = 0 : i64, tpu.core_type = #tpu.core_type<tc>} {
    %c0 = arith.constant 0 : index
    %c0_0 = arith.constant 0 : index
    %0 = vector.load %arg0[%c0, %c0_0] : memref<64x1xi32, #tpu.memory_space<vmem>>, vector<64x1xi32>
    %1 = tpu.iota {dimensions = array<i32: 1>} : vector<64x128xi32>
    %2 = vector.broadcast %0 : vector<64x1xi32> to vector<64x128xi32>
    %3 = arith.cmpi eq, %1, %2 : vector<64x128xi32>
    %4 = arith.extui %3 : vector<64x128xi1> to vector<64x128xi32>
    %5 = arith.sitofp %4 : vector<64x128xi32> to vector<64x128xf32>
    %c0_1 = arith.constant 0 : index
    %c0_2 = arith.constant 0 : index
    %6 = vector.load %arg1[%c0_1, %c0_2] : memref<128x96xf32, #tpu.memory_space<vmem>>, vector<128x96xf32>
    %cst = arith.constant dense<0.000000e+00> : vector<64x96xf32>
    %7 = tpu.matmul %5, %6, %cst {dimension_numbers = #tpu.dot_dimension_numbers<[1], [0], [0], [1], [0, 0, 1, 1], [], []>} : vector<64x128xf32>, vector<128x96xf32>, vector<64x96xf32> -> vector<64x96xf32>
    %c0_3 = arith.constant 0 : index
    %c0_4 = arith.constant 0 : index
    %8 = vector.load %arg2[%c0_3, %c0_4] : memref<1x96xf32, #tpu.memory_space<vmem>>, vector<1x96xf32>
    %9 = vector.broadcast %8 : vector<1x96xf32> to vector<64x96xf32>
    %10 = arith.addf %7, %9 : vector<64x96xf32>
    %c0_5 = arith.constant 0 : index
    %c0_6 = arith.constant 0 : index
    %11 = vector.load %arg4[%c0_5, %c0_6] : memref<1x96xf32, #tpu.memory_space<vmem>>, vector<1x96xf32>
    %12 = vector.extract_strided_slice %10 {offsets = [0, 0], sizes = [64, 64], strides = [1, 1]} : vector<64x96xf32> to vector<64x64xf32>
    %13 = vector.extract_strided_slice %11 {offsets = [0, 0], sizes = [1, 64], strides = [1, 1]} : vector<1x96xf32> to vector<1x64xf32>
    %14 = vector.broadcast %13 : vector<1x64xf32> to vector<64x64xf32>
    %15 = arith.addf %12, %14 : vector<64x64xf32>
    %16 = vector.extract_strided_slice %10 {offsets = [0, 64], sizes = [64, 32], strides = [1, 1]} : vector<64x96xf32> to vector<64x32xf32>
    %17 = vector.extract_strided_slice %11 {offsets = [0, 64], sizes = [1, 32], strides = [1, 1]} : vector<1x96xf32> to vector<1x32xf32>
    %18 = vector.shape_cast %17 : vector<1x32xf32> to vector<1x32xf32>
    %19 = vector.broadcast %18 : vector<1x32xf32> to vector<8x32xf32>
    %c0_7 = arith.constant 0 : index
    %c0_8 = arith.constant 0 : index
    %20 = vector.load %arg3[%c0_7, %c0_8] : memref<32x96xf32, #tpu.memory_space<vmem>>, vector<32x96xf32>
    %cst_9 = arith.constant 0.000000e+00 : f32
    %21 = vector.broadcast %cst_9 : f32 to vector<8x32xf32>
    %cst_10 = arith.constant dense<0.000000e+00> : vector<8x96xf32>
    %22 = tpu.matmul %21, %20, %cst_10 {dimension_numbers = #tpu.dot_dimension_numbers<[1], [0], [0], [1], [0, 0, 1, 1], [], []>} : vector<8x32xf32>, vector<32x96xf32>, vector<8x96xf32> -> vector<8x96xf32>
    %23 = vector.extract_strided_slice %15 {offsets = [0, 0], sizes = [8, 64], strides = [1, 1]} : vector<64x64xf32> to vector<8x64xf32>
    %24 = vector.extract_strided_slice %22 {offsets = [0, 0], sizes = [8, 64], strides = [1, 1]} : vector<8x96xf32> to vector<8x64xf32>
    %25 = arith.addf %23, %24 : vector<8x64xf32>
    %26 = arith.negf %25 : vector<8x64xf32>
    %27 = math.exp %26 : vector<8x64xf32>
    %cst_11 = arith.constant 1.000000e+00 : f32
    %28 = vector.broadcast %cst_11 : f32 to vector<8x64xf32>
    %29 = arith.addf %28, %27 : vector<8x64xf32>
    %30 = arith.divf %28, %29 : vector<8x64xf32>
    %31 = vector.extract_strided_slice %30 {offsets = [0, 0], sizes = [8, 32], strides = [1, 1]} : vector<8x64xf32> to vector<8x32xf32>
    %32 = vector.extract_strided_slice %30 {offsets = [0, 32], sizes = [8, 32], strides = [1, 1]} : vector<8x64xf32> to vector<8x32xf32>
    %33 = vector.extract_strided_slice %16 {offsets = [0, 0], sizes = [8, 32], strides = [1, 1]} : vector<64x32xf32> to vector<8x32xf32>
    %34 = vector.extract_strided_slice %22 {offsets = [0, 64], sizes = [8, 32], strides = [1, 1]} : vector<8x96xf32> to vector<8x32xf32>
    %35 = arith.addf %34, %19 : vector<8x32xf32>
    %36 = arith.mulf %31, %35 : vector<8x32xf32>
    %37 = arith.addf %33, %36 : vector<8x32xf32>
    %38 = math.tanh %37 : vector<8x32xf32>
    %cst_12 = arith.constant 1.000000e+00 : f32
    %39 = vector.broadcast %cst_12 : f32 to vector<8x32xf32>
    %40 = arith.subf %39, %32 : vector<8x32xf32>
    %41 = arith.mulf %40, %38 : vector<8x32xf32>
    %42 = arith.mulf %32, %21 : vector<8x32xf32>
    %43 = arith.addf %41, %42 : vector<8x32xf32>
    %cst_13 = arith.constant dense<0.000000e+00> : vector<8x96xf32>
    %44 = tpu.matmul %43, %20, %cst_13 {dimension_numbers = #tpu.dot_dimension_numbers<[1], [0], [0], [1], [0, 0, 1, 1], [], []>} : vector<8x32xf32>, vector<32x96xf32>, vector<8x96xf32> -> vector<8x96xf32>
    %45 = vector.extract_strided_slice %15 {offsets = [8, 0], sizes = [8, 64], strides = [1, 1]} : vector<64x64xf32> to vector<8x64xf32>
    %46 = vector.extract_strided_slice %44 {offsets = [0, 0], sizes = [8, 64], strides = [1, 1]} : vector<8x96xf32> to vector<8x64xf32>
    %47 = arith.addf %45, %46 : vector<8x64xf32>
    %48 = arith.negf %47 : vector<8x64xf32>
    %49 = math.exp %48 : vector<8x64xf32>
    %cst_14 = arith.constant 1.000000e+00 : f32
    %50 = vector.broadcast %cst_14 : f32 to vector<8x64xf32>
    %51 = arith.addf %50, %49 : vector<8x64xf32>
    %52 = arith.divf %50, %51 : vector<8x64xf32>
    %53 = vector.extract_strided_slice %52 {offsets = [0, 0], sizes = [8, 32], strides = [1, 1]} : vector<8x64xf32> to vector<8x32xf32>
    %54 = vector.extract_strided_slice %52 {offsets = [0, 32], sizes = [8, 32], strides = [1, 1]} : vector<8x64xf32> to vector<8x32xf32>
    %55 = vector.extract_strided_slice %16 {offsets = [8, 0], sizes = [8, 32], strides = [1, 1]} : vector<64x32xf32> to vector<8x32xf32>
    %56 = vector.extract_strided_slice %44 {offsets = [0, 64], sizes = [8, 32], strides = [1, 1]} : vector<8x96xf32> to vector<8x32xf32>
    %57 = arith.addf %56, %19 : vector<8x32xf32>
    %58 = arith.mulf %53, %57 : vector<8x32xf32>
    %59 = arith.addf %55, %58 : vector<8x32xf32>
    %60 = math.tanh %59 : vector<8x32xf32>
    %cst_15 = arith.constant 1.000000e+00 : f32
    %61 = vector.broadcast %cst_15 : f32 to vector<8x32xf32>
    %62 = arith.subf %61, %54 : vector<8x32xf32>
    %63 = arith.mulf %62, %60 : vector<8x32xf32>
    %64 = arith.mulf %54, %43 : vector<8x32xf32>
    %65 = arith.addf %63, %64 : vector<8x32xf32>
    %cst_16 = arith.constant dense<0.000000e+00> : vector<8x96xf32>
    %66 = tpu.matmul %65, %20, %cst_16 {dimension_numbers = #tpu.dot_dimension_numbers<[1], [0], [0], [1], [0, 0, 1, 1], [], []>} : vector<8x32xf32>, vector<32x96xf32>, vector<8x96xf32> -> vector<8x96xf32>
    %67 = vector.extract_strided_slice %15 {offsets = [16, 0], sizes = [8, 64], strides = [1, 1]} : vector<64x64xf32> to vector<8x64xf32>
    %68 = vector.extract_strided_slice %66 {offsets = [0, 0], sizes = [8, 64], strides = [1, 1]} : vector<8x96xf32> to vector<8x64xf32>
    %69 = arith.addf %67, %68 : vector<8x64xf32>
    %70 = arith.negf %69 : vector<8x64xf32>
    %71 = math.exp %70 : vector<8x64xf32>
    %cst_17 = arith.constant 1.000000e+00 : f32
    %72 = vector.broadcast %cst_17 : f32 to vector<8x64xf32>
    %73 = arith.addf %72, %71 : vector<8x64xf32>
    %74 = arith.divf %72, %73 : vector<8x64xf32>
    %75 = vector.extract_strided_slice %74 {offsets = [0, 0], sizes = [8, 32], strides = [1, 1]} : vector<8x64xf32> to vector<8x32xf32>
    %76 = vector.extract_strided_slice %74 {offsets = [0, 32], sizes = [8, 32], strides = [1, 1]} : vector<8x64xf32> to vector<8x32xf32>
    %77 = vector.extract_strided_slice %16 {offsets = [16, 0], sizes = [8, 32], strides = [1, 1]} : vector<64x32xf32> to vector<8x32xf32>
    %78 = vector.extract_strided_slice %66 {offsets = [0, 64], sizes = [8, 32], strides = [1, 1]} : vector<8x96xf32> to vector<8x32xf32>
    %79 = arith.addf %78, %19 : vector<8x32xf32>
    %80 = arith.mulf %75, %79 : vector<8x32xf32>
    %81 = arith.addf %77, %80 : vector<8x32xf32>
    %82 = math.tanh %81 : vector<8x32xf32>
    %cst_18 = arith.constant 1.000000e+00 : f32
    %83 = vector.broadcast %cst_18 : f32 to vector<8x32xf32>
    %84 = arith.subf %83, %76 : vector<8x32xf32>
    %85 = arith.mulf %84, %82 : vector<8x32xf32>
    %86 = arith.mulf %76, %65 : vector<8x32xf32>
    %87 = arith.addf %85, %86 : vector<8x32xf32>
    %cst_19 = arith.constant dense<0.000000e+00> : vector<8x96xf32>
    %88 = tpu.matmul %87, %20, %cst_19 {dimension_numbers = #tpu.dot_dimension_numbers<[1], [0], [0], [1], [0, 0, 1, 1], [], []>} : vector<8x32xf32>, vector<32x96xf32>, vector<8x96xf32> -> vector<8x96xf32>
    %89 = vector.extract_strided_slice %15 {offsets = [24, 0], sizes = [8, 64], strides = [1, 1]} : vector<64x64xf32> to vector<8x64xf32>
    %90 = vector.extract_strided_slice %88 {offsets = [0, 0], sizes = [8, 64], strides = [1, 1]} : vector<8x96xf32> to vector<8x64xf32>
    %91 = arith.addf %89, %90 : vector<8x64xf32>
    %92 = arith.negf %91 : vector<8x64xf32>
    %93 = math.exp %92 : vector<8x64xf32>
    %cst_20 = arith.constant 1.000000e+00 : f32
    %94 = vector.broadcast %cst_20 : f32 to vector<8x64xf32>
    %95 = arith.addf %94, %93 : vector<8x64xf32>
    %96 = arith.divf %94, %95 : vector<8x64xf32>
    %97 = vector.extract_strided_slice %96 {offsets = [0, 0], sizes = [8, 32], strides = [1, 1]} : vector<8x64xf32> to vector<8x32xf32>
    %98 = vector.extract_strided_slice %96 {offsets = [0, 32], sizes = [8, 32], strides = [1, 1]} : vector<8x64xf32> to vector<8x32xf32>
    %99 = vector.extract_strided_slice %16 {offsets = [24, 0], sizes = [8, 32], strides = [1, 1]} : vector<64x32xf32> to vector<8x32xf32>
    %100 = vector.extract_strided_slice %88 {offsets = [0, 64], sizes = [8, 32], strides = [1, 1]} : vector<8x96xf32> to vector<8x32xf32>
    %101 = arith.addf %100, %19 : vector<8x32xf32>
    %102 = arith.mulf %97, %101 : vector<8x32xf32>
    %103 = arith.addf %99, %102 : vector<8x32xf32>
    %104 = math.tanh %103 : vector<8x32xf32>
    %cst_21 = arith.constant 1.000000e+00 : f32
    %105 = vector.broadcast %cst_21 : f32 to vector<8x32xf32>
    %106 = arith.subf %105, %98 : vector<8x32xf32>
    %107 = arith.mulf %106, %104 : vector<8x32xf32>
    %108 = arith.mulf %98, %87 : vector<8x32xf32>
    %109 = arith.addf %107, %108 : vector<8x32xf32>
    %cst_22 = arith.constant dense<0.000000e+00> : vector<8x96xf32>
    %110 = tpu.matmul %109, %20, %cst_22 {dimension_numbers = #tpu.dot_dimension_numbers<[1], [0], [0], [1], [0, 0, 1, 1], [], []>} : vector<8x32xf32>, vector<32x96xf32>, vector<8x96xf32> -> vector<8x96xf32>
    %111 = vector.extract_strided_slice %15 {offsets = [32, 0], sizes = [8, 64], strides = [1, 1]} : vector<64x64xf32> to vector<8x64xf32>
    %112 = vector.extract_strided_slice %110 {offsets = [0, 0], sizes = [8, 64], strides = [1, 1]} : vector<8x96xf32> to vector<8x64xf32>
    %113 = arith.addf %111, %112 : vector<8x64xf32>
    %114 = arith.negf %113 : vector<8x64xf32>
    %115 = math.exp %114 : vector<8x64xf32>
    %cst_23 = arith.constant 1.000000e+00 : f32
    %116 = vector.broadcast %cst_23 : f32 to vector<8x64xf32>
    %117 = arith.addf %116, %115 : vector<8x64xf32>
    %118 = arith.divf %116, %117 : vector<8x64xf32>
    %119 = vector.extract_strided_slice %118 {offsets = [0, 0], sizes = [8, 32], strides = [1, 1]} : vector<8x64xf32> to vector<8x32xf32>
    %120 = vector.extract_strided_slice %118 {offsets = [0, 32], sizes = [8, 32], strides = [1, 1]} : vector<8x64xf32> to vector<8x32xf32>
    %121 = vector.extract_strided_slice %16 {offsets = [32, 0], sizes = [8, 32], strides = [1, 1]} : vector<64x32xf32> to vector<8x32xf32>
    %122 = vector.extract_strided_slice %110 {offsets = [0, 64], sizes = [8, 32], strides = [1, 1]} : vector<8x96xf32> to vector<8x32xf32>
    %123 = arith.addf %122, %19 : vector<8x32xf32>
    %124 = arith.mulf %119, %123 : vector<8x32xf32>
    %125 = arith.addf %121, %124 : vector<8x32xf32>
    %126 = math.tanh %125 : vector<8x32xf32>
    %cst_24 = arith.constant 1.000000e+00 : f32
    %127 = vector.broadcast %cst_24 : f32 to vector<8x32xf32>
    %128 = arith.subf %127, %120 : vector<8x32xf32>
    %129 = arith.mulf %128, %126 : vector<8x32xf32>
    %130 = arith.mulf %120, %109 : vector<8x32xf32>
    %131 = arith.addf %129, %130 : vector<8x32xf32>
    %cst_25 = arith.constant dense<0.000000e+00> : vector<8x96xf32>
    %132 = tpu.matmul %131, %20, %cst_25 {dimension_numbers = #tpu.dot_dimension_numbers<[1], [0], [0], [1], [0, 0, 1, 1], [], []>} : vector<8x32xf32>, vector<32x96xf32>, vector<8x96xf32> -> vector<8x96xf32>
    %133 = vector.extract_strided_slice %15 {offsets = [40, 0], sizes = [8, 64], strides = [1, 1]} : vector<64x64xf32> to vector<8x64xf32>
    %134 = vector.extract_strided_slice %132 {offsets = [0, 0], sizes = [8, 64], strides = [1, 1]} : vector<8x96xf32> to vector<8x64xf32>
    %135 = arith.addf %133, %134 : vector<8x64xf32>
    %136 = arith.negf %135 : vector<8x64xf32>
    %137 = math.exp %136 : vector<8x64xf32>
    %cst_26 = arith.constant 1.000000e+00 : f32
    %138 = vector.broadcast %cst_26 : f32 to vector<8x64xf32>
    %139 = arith.addf %138, %137 : vector<8x64xf32>
    %140 = arith.divf %138, %139 : vector<8x64xf32>
    %141 = vector.extract_strided_slice %140 {offsets = [0, 0], sizes = [8, 32], strides = [1, 1]} : vector<8x64xf32> to vector<8x32xf32>
    %142 = vector.extract_strided_slice %140 {offsets = [0, 32], sizes = [8, 32], strides = [1, 1]} : vector<8x64xf32> to vector<8x32xf32>
    %143 = vector.extract_strided_slice %16 {offsets = [40, 0], sizes = [8, 32], strides = [1, 1]} : vector<64x32xf32> to vector<8x32xf32>
    %144 = vector.extract_strided_slice %132 {offsets = [0, 64], sizes = [8, 32], strides = [1, 1]} : vector<8x96xf32> to vector<8x32xf32>
    %145 = arith.addf %144, %19 : vector<8x32xf32>
    %146 = arith.mulf %141, %145 : vector<8x32xf32>
    %147 = arith.addf %143, %146 : vector<8x32xf32>
    %148 = math.tanh %147 : vector<8x32xf32>
    %cst_27 = arith.constant 1.000000e+00 : f32
    %149 = vector.broadcast %cst_27 : f32 to vector<8x32xf32>
    %150 = arith.subf %149, %142 : vector<8x32xf32>
    %151 = arith.mulf %150, %148 : vector<8x32xf32>
    %152 = arith.mulf %142, %131 : vector<8x32xf32>
    %153 = arith.addf %151, %152 : vector<8x32xf32>
    %cst_28 = arith.constant dense<0.000000e+00> : vector<8x96xf32>
    %154 = tpu.matmul %153, %20, %cst_28 {dimension_numbers = #tpu.dot_dimension_numbers<[1], [0], [0], [1], [0, 0, 1, 1], [], []>} : vector<8x32xf32>, vector<32x96xf32>, vector<8x96xf32> -> vector<8x96xf32>
    %155 = vector.extract_strided_slice %15 {offsets = [48, 0], sizes = [8, 64], strides = [1, 1]} : vector<64x64xf32> to vector<8x64xf32>
    %156 = vector.extract_strided_slice %154 {offsets = [0, 0], sizes = [8, 64], strides = [1, 1]} : vector<8x96xf32> to vector<8x64xf32>
    %157 = arith.addf %155, %156 : vector<8x64xf32>
    %158 = arith.negf %157 : vector<8x64xf32>
    %159 = math.exp %158 : vector<8x64xf32>
    %cst_29 = arith.constant 1.000000e+00 : f32
    %160 = vector.broadcast %cst_29 : f32 to vector<8x64xf32>
    %161 = arith.addf %160, %159 : vector<8x64xf32>
    %162 = arith.divf %160, %161 : vector<8x64xf32>
    %163 = vector.extract_strided_slice %162 {offsets = [0, 0], sizes = [8, 32], strides = [1, 1]} : vector<8x64xf32> to vector<8x32xf32>
    %164 = vector.extract_strided_slice %162 {offsets = [0, 32], sizes = [8, 32], strides = [1, 1]} : vector<8x64xf32> to vector<8x32xf32>
    %165 = vector.extract_strided_slice %16 {offsets = [48, 0], sizes = [8, 32], strides = [1, 1]} : vector<64x32xf32> to vector<8x32xf32>
    %166 = vector.extract_strided_slice %154 {offsets = [0, 64], sizes = [8, 32], strides = [1, 1]} : vector<8x96xf32> to vector<8x32xf32>
    %167 = arith.addf %166, %19 : vector<8x32xf32>
    %168 = arith.mulf %163, %167 : vector<8x32xf32>
    %169 = arith.addf %165, %168 : vector<8x32xf32>
    %170 = math.tanh %169 : vector<8x32xf32>
    %cst_30 = arith.constant 1.000000e+00 : f32
    %171 = vector.broadcast %cst_30 : f32 to vector<8x32xf32>
    %172 = arith.subf %171, %164 : vector<8x32xf32>
    %173 = arith.mulf %172, %170 : vector<8x32xf32>
    %174 = arith.mulf %164, %153 : vector<8x32xf32>
    %175 = arith.addf %173, %174 : vector<8x32xf32>
    %cst_31 = arith.constant dense<0.000000e+00> : vector<8x96xf32>
    %176 = tpu.matmul %175, %20, %cst_31 {dimension_numbers = #tpu.dot_dimension_numbers<[1], [0], [0], [1], [0, 0, 1, 1], [], []>} : vector<8x32xf32>, vector<32x96xf32>, vector<8x96xf32> -> vector<8x96xf32>
    %177 = vector.extract_strided_slice %15 {offsets = [56, 0], sizes = [8, 64], strides = [1, 1]} : vector<64x64xf32> to vector<8x64xf32>
    %178 = vector.extract_strided_slice %176 {offsets = [0, 0], sizes = [8, 64], strides = [1, 1]} : vector<8x96xf32> to vector<8x64xf32>
    %179 = arith.addf %177, %178 : vector<8x64xf32>
    %180 = arith.negf %179 : vector<8x64xf32>
    %181 = math.exp %180 : vector<8x64xf32>
    %cst_32 = arith.constant 1.000000e+00 : f32
    %182 = vector.broadcast %cst_32 : f32 to vector<8x64xf32>
    %183 = arith.addf %182, %181 : vector<8x64xf32>
    %184 = arith.divf %182, %183 : vector<8x64xf32>
    %185 = vector.extract_strided_slice %184 {offsets = [0, 0], sizes = [8, 32], strides = [1, 1]} : vector<8x64xf32> to vector<8x32xf32>
    %186 = vector.extract_strided_slice %184 {offsets = [0, 32], sizes = [8, 32], strides = [1, 1]} : vector<8x64xf32> to vector<8x32xf32>
    %187 = vector.extract_strided_slice %16 {offsets = [56, 0], sizes = [8, 32], strides = [1, 1]} : vector<64x32xf32> to vector<8x32xf32>
    %188 = vector.extract_strided_slice %176 {offsets = [0, 64], sizes = [8, 32], strides = [1, 1]} : vector<8x96xf32> to vector<8x32xf32>
    %189 = arith.addf %188, %19 : vector<8x32xf32>
    %190 = arith.mulf %185, %189 : vector<8x32xf32>
    %191 = arith.addf %187, %190 : vector<8x32xf32>
    %192 = math.tanh %191 : vector<8x32xf32>
    %cst_33 = arith.constant 1.000000e+00 : f32
    %193 = vector.broadcast %cst_33 : f32 to vector<8x32xf32>
    %194 = arith.subf %193, %186 : vector<8x32xf32>
    %195 = arith.mulf %194, %192 : vector<8x32xf32>
    %196 = arith.mulf %186, %175 : vector<8x32xf32>
    %197 = arith.addf %195, %196 : vector<8x32xf32>
    %198 = tpu.concatenate %43, %65, %87, %109, %131, %153, %175, %197 in 0 : vector<8x32xf32>, vector<8x32xf32>, vector<8x32xf32>, vector<8x32xf32>, vector<8x32xf32>, vector<8x32xf32>, vector<8x32xf32>, vector<8x32xf32> -> vector<64x32xf32>
    %c0_34 = arith.constant 0 : index
    %c0_35 = arith.constant 0 : index
    %199 = vector.load %arg5[%c0_34, %c0_35] : memref<32x32xf32, #tpu.memory_space<vmem>>, vector<32x32xf32>
    %cst_36 = arith.constant dense<0.000000e+00> : vector<64x32xf32>
    %200 = tpu.matmul %198, %199, %cst_36 {dimension_numbers = #tpu.dot_dimension_numbers<[1], [0], [0], [1], [0, 0, 1, 1], [], []>} : vector<64x32xf32>, vector<32x32xf32>, vector<64x32xf32> -> vector<64x32xf32>
    %c0_37 = arith.constant 0 : index
    %c0_38 = arith.constant 0 : index
    %201 = vector.load %arg6[%c0_37, %c0_38] : memref<1x32xf32, #tpu.memory_space<vmem>>, vector<1x32xf32>
    %202 = vector.broadcast %201 : vector<1x32xf32> to vector<64x32xf32>
    %203 = arith.addf %200, %202 : vector<64x32xf32>
    %204 = math.tanh %203 : vector<64x32xf32>
    %c0_39 = arith.constant 0 : index
    %c0_40 = arith.constant 0 : index
    %205 = vector.load %arg7[%c0_39, %c0_40] : memref<32x128xf32, #tpu.memory_space<vmem>>, vector<32x128xf32>
    %cst_41 = arith.constant dense<0.000000e+00> : vector<64x128xf32>
    %206 = tpu.matmul %204, %205, %cst_41 {dimension_numbers = #tpu.dot_dimension_numbers<[1], [0], [0], [1], [0, 0, 1, 1], [], []>} : vector<64x32xf32>, vector<32x128xf32>, vector<64x128xf32> -> vector<64x128xf32>
    %207 = tpu.iota {dimensions = array<i32: 1>} : vector<64x128xi32>
    %c0_i32 = arith.constant 0 : i32
    %208 = vector.broadcast %c0_i32 : i32 to vector<64x128xi32>
    %209 = arith.cmpi eq, %207, %208 : vector<64x128xi32>
    %cst_42 = arith.constant 0xFF800000 : f32
    %210 = vector.broadcast %cst_42 : f32 to vector<64x128xf32>
    %211 = arith.select %209, %210, %206 : vector<64x128xi1>, vector<64x128xf32>
    %cst_43 = arith.constant dense<0xFF800000> : vector<64xf32>
    %212 = vector.multi_reduction <maximumf>, %211, %cst_43 [1] : vector<64x128xf32> to vector<64xf32>
    %213 = vector.shape_cast %212 : vector<64xf32> to vector<64x1xf32>
    %214 = vector.broadcast %213 : vector<64x1xf32> to vector<64x128xf32>
    %215 = arith.subf %211, %214 : vector<64x128xf32>
    %216 = math.exp %215 : vector<64x128xf32>
    %cst_44 = arith.constant dense<0.000000e+00> : vector<64xf32>
    %217 = vector.multi_reduction <add>, %216, %cst_44 [1] : vector<64x128xf32> to vector<64xf32>
    %218 = vector.shape_cast %217 : vector<64xf32> to vector<64x1xf32>
    %219 = math.log %218 : vector<64x1xf32>
    %220 = arith.addf %219, %213 : vector<64x1xf32>
    %221 = vector.broadcast %220 : vector<64x1xf32> to vector<64x128xf32>
    %222 = arith.subf %211, %221 : vector<64x128xf32>
    %c0_45 = arith.constant 0 : index
    %c0_46 = arith.constant 0 : index
    %223 = vector.load %arg8[%c0_45, %c0_46] : memref<64x128xf32, #tpu.memory_space<vmem>>, vector<64x128xf32>
    tpu.vector_store %arg8[%c0_45, %c0_46], %222 {strides = array<i32>} : memref<64x128xf32, #tpu.memory_space<vmem>>, vector<64x128xf32>,
    return
  }
}

</mosaic_0001>

<bundles_post_ra>
// kernel: disentangle_rnnlm_forward.1
= control target key start
LH: loop header
LB: loop body
LE: loop exit
PB: predicated region body
PF: predicated region fallthrough
CT: control target
= control target key end

     0   :  { %v1935_v0 = vmov 0   ;;  %v1936_v3 = vmov 0.0|0.0   ;;  %vm1937_vm0 = vmmov 0   ;;  %v1938_v8 = vmov 0.0   ;;  %s1940_s26 = smov 64   ;;  %s2400_s0 = inlined_call_operand.vmem [shape: s32[64,1], index: 0, kind: input, shape index: {}]   ;;  %s2401_s3 = inlined_call_operand.vmem [shape: f32[32,96], index: 3, kind: input, shape index: {}]   ;;  %s2402_s1 = inlined_call_operand.vmem [shape: f32[128,96], index: 1, kind: input, shape index: {}]   ;;  %s2403_s4 = inlined_call_operand.vmem [shape: f32[1,96], index: 4, kind: input, shape index: {}]   ;;  %s2404_s2 = inlined_call_operand.vmem [shape: f32[1,96], index: 2, kind: input, shape index: {}]   ;;  %s2405_s5 = inlined_call_operand.vmem [shape: f32[32,32], index: 5, kind: input, shape index: {}]   ;;  %s2406_s7 = inlined_call_operand.vmem [shape: f32[32,128], index: 7, kind: input, shape index: {}]   ;;  %s2407_s6 = inlined_call_operand.vmem [shape: f32[1,32], index: 6, kind: input, shape index: {}]   ;;  %s2408_s8 = inlined_call_operand.vmem [shape: f32[64,128], index: 8, kind: output, shape index: {}]  }
   0x1   :  { %1837 = vset.pattern.permute.xlu0 %v1935_v0  ;;  %v29_v1 = vld [vmem:[%s2400_s0] sm:$0xff]  ;;  %v30_v2 = vld [vmem:[%s2400_s0 + $0x8] sm:$0xff]  ;;  %1762 = vmatprep.subr.bf16.mxu1 %v1936_v3  ;;  %v232_v6 = vld [vmem:[%s2401_s3 + $0x10] sm:$0xff]  ;;  %v37_v35 = vlaneseq  ;;  %v1939_v38 = vmov 1.0   ;;  %vm234_vm3 = vcmask 261120  }
   0x2   :  { %v230_v4 = vld [vmem:[%s2401_s3] sm:$0xff]  ;;  %40 = vperm.xlu0 %1837, %v29_v1   ;;  %v231_v5 = vld [vmem:[%s2401_s3 + $0x8] sm:$0xff]  ;;  %v233_v7 = vld [vmem:[%s2401_s3 + $0x18] sm:$0xff]  ;;  %1610 = vmatprep.mubr.msk.f32.mxu1 %vm1937_vm0, %v1938_v8 }
   0x3   :  { %v2008_v9 = vpack.c.bf16 %v231_v5, %v230_v4  ;;  %v87_v10 = vld [vmem:[%s2402_s1] sm:$0xff]  ;;  %v88_v11 = vld [vmem:[%s2402_s1 + $0x8] sm:$0xff]  ;;  %v89_v12 = vld [vmem:[%s2402_s1 + $0x10] sm:$0xff]  ;;  %1838 = vset.pattern.permute.xlu1 %v1935_v0  ;;  %v2023_v15 = vpack.c.bf16 %v233_v7, %v232_v6  ;;  %v2072_v36 = vand.u32 127, %v37_v35 }
   0x4   :  { %v1730_v13 = vpack.c.bf16 %v88_v11, %v87_v10  ;;  %v90_v14 = vld [vmem:[%s2402_s1 + $0x18] sm:$0xff]  ;;  %v91_v17 = vld [vmem:[%s2402_s1 + $0x20] sm:$0xff]  ;;  %v92_v18 = vld [vmem:[%s2402_s1 + $0x28] sm:$0xff] }
   0x5   :  { %1764 = vmatpush3.bf16.msra.mxu1 %v2008_v9  ;;  %v1734_v16 = vpack.c.bf16 %v90_v14, %v89_v12  ;;  %v1738_v19 = vpack.c.bf16 %v92_v18, %v91_v17  ;;  %v93_v20 = vld [vmem:[%s2402_s1 + $0x30] sm:$0xff]  ;;  %v94_v21 = vld [vmem:[%s2402_s1 + $0x38] sm:$0xff]  ;;  %v95_v23 = vld [vmem:[%s2402_s1 + $0x40] sm:$0xff]  ;;  %vm1311_vm10 = vcmp.eq.s32.totalorder %v2072_v36, 0 }
   0x6   :  { %43 = vperm.xlu0 %1837, %v30_v2   ;;  %1765 = vmatprep.subr.bf16.mxu1 %v1936_v3  ;;  %v1742_v22 = vpack.c.bf16 %v94_v21, %v93_v20  ;;  %v96_v24 = vld [vmem:[%s2402_s1 + $0x48] sm:$0xff]  ;;  %v97_v26 = vld [vmem:[%s2402_s1 + $0x50] sm:$0xff]  ;;  %v98_v27 = vld [vmem:[%s2402_s1 + $0x58] sm:$0xff] }
   0x7   :  { %1731 = vmatprep.subr.bf16.mxu0 %v1730_v13  ;;  %v1746_v25 = vpack.c.bf16 %v96_v24, %v95_v23  ;;  %v1750_v28 = vpack.c.bf16 %v98_v27, %v97_v26  ;;  %v99_v29 = vld [vmem:[%s2402_s1 + $0x60] sm:$0xff]  ;;  %v100_v30 = vld [vmem:[%s2402_s1 + $0x68] sm:$0xff]  ;;  %v101_v32 = vld [vmem:[%s2402_s1 + $0x70] sm:$0xff] }
   0x8   :  { %1733 = vmatpush3.bf16.msra.mxu0 %v1730_v13  ;;  %v1754_v31 = vpack.c.bf16 %v100_v30, %v99_v29  ;;  %v102_v33 = vld [vmem:[%s2402_s1 + $0x78] sm:$0xff]  ;;  %v2085_v40 = vld [vmem:[%s2403_s4] ss:$0 sm:$0xff]  ;;  %v31_v20 = vld [vmem:[%s2400_s0 + $0x10] sm:$0xff] }
   0x9   :  { %1767 = vmatpush3.bf16.msra.mxu1 %v2023_v15  ;;  %1735 = vmatprep.subr.bf16.mxu0 %v1734_v16  ;;  %v1758_v34 = vpack.c.bf16 %v102_v33, %v101_v32  ;;  %v2092_v44 = vld [vmem:[%s2404_s2] ss:$0 sm:$0xff]  ;;  %s1941_s2 = smov 96   ;;  %v32_v26 = vld [vmem:[%s2400_s0 + $0x18] sm:$0xff] }
   0xa   :  { %1768 = vmatprep.subr.bf16.mxu1 %v1936_v3 }
   0xc   :  { %1611 = vmatmul.mubr.f32.vlgmr.msra.gmra.mrb[0].mxu1 %v1938_v8  ;;  %1737 = vmatpush3.bf16.msra.mxu0 %v1734_v16 }
   0xd   :  { %1739 = vmatprep.subr.bf16.mxu0 %v1738_v19  ;;  %1770 = vmatpush3.bf16.msra.mxu1 %v2008_v9 }
   0xe   :  { %1771 = vmatprep.subr.bf16.mxu1 %v1936_v3  ;;  %1621 = vmatprep.mubr.msk.f32.mxu1 %vm1937_vm0, %v1938_v8 }
  0x10   :  { %1741 = vmatpush3.bf16.msra.mxu0 %v1738_v19 }
  0x11   :  { %1743 = vmatprep.subr.bf16.mxu0 %v1742_v22  ;;  %1773 = vmatpush3.bf16.msra.mxu1 %v2023_v15 }
  0x12   :  { %1774 = vmatprep.subr.bf16.mxu1 %v1936_v3 }
  0x14   :  { %1745 = vmatpush3.bf16.msra.mxu0 %v1742_v22 }
  0x15   :  { %1747 = vmatprep.subr.bf16.mxu0 %v1746_v25 }
  0x18   :  { %1749 = vmatpush3.bf16.msra.mxu0 %v1746_v25 }
  0x19   :  { %1751 = vmatprep.subr.bf16.mxu0 %v1750_v28 }
  0x1c   :  { %1753 = vmatpush3.bf16.msra.mxu0 %v1750_v28 }
  0x1d   :  { %1755 = vmatprep.subr.bf16.mxu0 %v1754_v31 }
  0x20   :  { %1757 = vmatpush3.bf16.msra.mxu0 %v1754_v31 }
  0x21   :  { %1759 = vmatprep.subr.bf16.mxu0 %v1758_v34 }
  0x24   :  { %1761 = vmatpush3.bf16.msra.mxu0 %v1758_v34 }
  0x25   :  { %1792 = vmatprep.subr.bf16.mxu0 %v1936_v3 }
  0x81   :  { %v41_v37 = vpop.permute.xlu0 %40 }
  0x82   :  { %vm63_vm1 = vcmp.eq.s32.totalorder %v2072_v36, %v41_v37 }
  0x83   :  { %1590 = vmatprep.mubr.msk.f32.mxu0 %vm63_vm1, %v1939_v38 }
  0x85   :  { %v44_v39 = vpop.permute.xlu0 %43 }
  0x86   :  { %vm64_vm2 = vcmp.eq.s32.totalorder %v2072_v36, %v44_v39 }
  0x87   :  { %1591 = vmatmul.mubr.msk.f32.vlgmr.msra.gmra.mrb[0].mxu0 %vm64_vm2, %v1939_v38 }
  0x88   :  { %1794 = vmatpush3.bf16.msra.mxu0 %v2008_v9 }
  0x89   :  { %1795 = vmatprep.subr.bf16.mxu0 %v1936_v3 }
  0x8c   :  { %1797 = vmatpush3.bf16.msra.mxu0 %v2023_v15 }
  0x8d   :  { %1804 = vmatprep.subr.bf16.mxu0 %v1936_v3 }
  0xdf   :  { %v304_v41 = vpop.f32.mrb[0].mxu1 }
  0xe0   :  { %v1612_v42 = vpop.f32.mrb[1].mxu1  ;;  %v315_v43 = vadd.f32 %v2085_v40, %v304_v41 }
  0xe2   :  { %317 = vrot.lane.b32.xlu1 %v315_v43, %s1940_s26 }
 0x154   :  { %v318_v53 = vpop.permute.xlu1 %317 }
 0x15a   :  { %v1592_v45 = vpop.f32.mrb[0].mxu0 }
 0x15b   :  { %v176_v46 = vpop.f32.mrb[1].mxu0  ;;  %v182_v5 = vadd.f32 %v1592_v45, %v2092_v44 }
 0x15c   :  { %v177_v47 = vadd.f32 %v2092_v44, %v176_v46 }
 0x15d   :  { %v223_v6 = vadd.f32 %v2085_v40, %v182_v5 }
 0x15e   :  { %v222_v48 = vadd.f32 %v2085_v40, %v177_v47 }
 0x160   :  { %v308_v49 = vadd.f32 %v304_v41, %v222_v48 }
 0x162   :  { %v1438_v50 = vmul.f32 -1.442695, %v308_v49 }
 0x164   :  { %1839 = vpow2.f32 %v1438_v50 }
 0x16e   :  { %v1840_v51 = vpop.eup %1839 }
 0x16f   :  { %v312_v52 = vadd.f32 1.0, %v1840_v51 }
 0x171   :  { %1841 = vrcp.f32 %v312_v52 }
 0x17b   :  { %v1842_v54 = vpop.eup %1841 }
 0x17c   :  { %v320_v55 = vmul.f32 %v1842_v54, %v318_v53  ;;  %v327_v59 = vsub.f32 1.0, %v1842_v54  ;;  %v333_v61 = vmul.f32 0.0, %v1842_v54 }
 0x17e   :  { %322 = vrot.lane.b32.xlu1 %v320_v55, %s1940_s26 }
 0x1f0   :  { %v323_v56 = vpop.permute.xlu1 %322 }
 0x1f1   :  { %v325_v57 = vadd.f32 %v323_v56, %v177_v47 }
 0x1f3   :  { %1843 = vtanh.f32 %v325_v57 }
 0x1fd   :  { %v1844_v58 = vpop.eup %1843 }
 0x1fe   :  { %329 = vrot.lane.b32.xlu0 %v1844_v58, %s1941_s2 }
 0x270   :  { %v330_v60 = vpop.permute.xlu0 %329 }
 0x271   :  { %v332_v62 = vmul.f32 %v330_v60, %v327_v59 }
 0x273   :  { %v334_v63 = vadd.f32 %v333_v61, %v332_v62 }
 0x275   :  { %336 = vrot.lane.b32.xlu1 %v334_v63, %s1941_s2 }
 0x2e7   :  { %v2099_v0 = vpop.permute.xlu1 %336 }
 0x2e8   :  { %1622 = vmatmul.mubr.msk.f32.vlgmr.msra.gmra.mrb[2].mxu1 %vm234_vm3, %v2099_v0 }
 0x2e9   :  { %1776 = vmatpush3.bf16.msra.mxu1 %v2008_v9  ;;  %1632 = vmatprep.mubr.msk.f32.mxu1 %vm1937_vm0, %v1938_v8 }
 0x2ea   :  { %1777 = vmatprep.subr.bf16.mxu1 %v1936_v3 }
 0x2ed   :  { %1779 = vmatpush3.bf16.msra.mxu1 %v2023_v15 }
 0x2ee   :  { %1780 = vmatprep.subr.bf16.mxu1 %v1936_v3 }
 0x3bb   :  { %v406_v1 = vpop.f32.mrb[2].mxu1 }
 0x3bc   :  { %v417_v2 = vadd.f32 %v2085_v40, %v406_v1  ;;  %v1623_v4 = vpop.f32.mrb[3].mxu1  ;;  %v410_v7 = vadd.f32 %v406_v1, %v223_v6 }
 0x3be   :  { %419 = vrot.lane.b32.xlu0 %v417_v2, %s1940_s26  ;;  %v1440_v10 = vmul.f32 -1.442695, %v410_v7 }
 0x3c0   :  { %1845 = vpow2.f32 %v1440_v10 }
 0x3ca   :  { %v1846_v11 = vpop.eup %1845 }
 0x3cb   :  { %v414_v12 = vadd.f32 1.0, %v1846_v11 }
 0x3cd   :  { %1847 = vrcp.f32 %v414_v12  ;;  %v33_v12 = vld [vmem:[%s2400_s0 + $0x20] sm:$0xff] }
 0x3d7   :  { %v1848_v13 = vpop.eup %1847 }
 0x3d8   :  { %v429_v21 = vsub.f32 1.0, %v1848_v13  ;;  %v435_v23 = vmul.f32 %v1848_v13, %v334_v63 }
 0x430   :  { %v420_v14 = vpop.permute.xlu0 %419 }
 0x431   :  { %v422_v16 = vmul.f32 %v1848_v13, %v420_v14 }
 0x433   :  { %424 = vrot.lane.b32.xlu1 %v422_v16, %s1940_s26 }
 0x4a5   :  { %v425_v17 = vpop.permute.xlu1 %424 }
 0x4a6   :  { %v427_v18 = vadd.f32 %v425_v17, %v182_v5 }
 0x4a8   :  { %1849 = vtanh.f32 %v427_v18 }
 0x4b2   :  { %v1850_v19 = vpop.eup %1849 }
 0x4b3   :  { %431 = vrot.lane.b32.xlu0 %v1850_v19, %s1941_s2  ;;  %v34_v19 = vld [vmem:[%s2400_s0 + $0x28] sm:$0xff] }
 0x4b7   :  { %46 = vperm.xlu0 %1837, %v31_v20  }
 0x525   :  { %v432_v22 = vpop.permute.xlu0 %431 }
 0x526   :  { %v434_v24 = vmul.f32 %v432_v22, %v429_v21 }
 0x528   :  { %v436_v25 = vadd.f32 %v435_v23, %v434_v24 }
 0x52a   :  { %438 = vrot.lane.b32.xlu1 %v436_v25, %s1941_s2 }
 0x52e   :  { %49 = vperm.xlu1 %1838, %v32_v26  }
 0x536   :  { %v47_v27 = vpop.permute.xlu0 %46 }
 0x537   :  { %vm65_vm4 = vcmp.eq.s32.totalorder %v2072_v36, %v47_v27 }
 0x538   :  { %1593 = vmatprep.mubr.msk.f32.mxu0 %vm65_vm4, %v1939_v38 }
 0x59c   :  { %v2124_v28 = vpop.permute.xlu1 %438 }
 0x59d   :  { %1633 = vmatmul.mubr.msk.f32.vlgmr.msra.gmra.mrb[4].mxu1 %vm234_vm3, %v2124_v28 }
 0x59e   :  { %1782 = vmatpush3.bf16.msra.mxu1 %v2008_v9  ;;  %1643 = vmatprep.mubr.msk.f32.mxu1 %vm1937_vm0, %v1938_v8 }
 0x59f   :  { %1783 = vmatprep.subr.bf16.mxu1 %v1936_v3 }
 0x5a2   :  { %1785 = vmatpush3.bf16.msra.mxu1 %v2023_v15 }
 0x5a3   :  { %1786 = vmatprep.subr.bf16.mxu1 %v1936_v3 }
 0x5ad   :  { %v50_v29 = vpop.permute.xlu1 %49 }
 0x5ae   :  { %vm66_vm5 = vcmp.eq.s32.totalorder %v2072_v36, %v50_v29 }
 0x5af   :  { %1594 = vmatmul.mubr.msk.f32.gmra.mrb[2].mxu0 %vm66_vm5, %v1939_v38 }
 0x670   :  { %v508_v30 = vpop.f32.mrb[4].mxu1 }
 0x671   :  { %v519_v31 = vadd.f32 %v2085_v40, %v508_v30  ;;  %v1634_v32 = vpop.f32.mrb[5].mxu1 }
 0x673   :  { %521 = vrot.lane.b32.xlu0 %v519_v31, %s1940_s26 }
 0x682   :  { %v1595_v33 = vpop.f32.mrb[2].mxu0 }
 0x683   :  { %v186_v34 = vpop.f32.mrb[3].mxu0  ;;  %v192_v60 = vadd.f32 %v1595_v33, %v2092_v44 }
 0x684   :  { %v187_v35 = vadd.f32 %v2092_v44, %v186_v34 }
 0x685   :  { %v225_v61 = vadd.f32 %v2085_v40, %v192_v60 }
 0x686   :  { %v224_v37 = vadd.f32 %v2085_v40, %v187_v35 }
 0x688   :  { %v512_v39 = vadd.f32 %v508_v30, %v224_v37 }
 0x68a   :  { %v1442_v41 = vmul.f32 -1.442695, %v512_v39 }
 0x68c   :  { %1851 = vpow2.f32 %v1442_v41  ;;  %v35_v41 = vld [vmem:[%s2400_s0 + $0x30] sm:$0xff] }
 0x696   :  { %v1852_v42 = vpop.eup %1851 }
 0x697   :  { %v516_v43 = vadd.f32 1.0, %v1852_v42 }
 0x699   :  { %1853 = vrcp.f32 %v516_v43 }
 0x6a3   :  { %v1854_v45 = vpop.eup %1853 }
 0x6a4   :  { %v531_v51 = vsub.f32 1.0, %v1854_v45  ;;  %v537_v53 = vmul.f32 %v1854_v45, %v436_v25 }
 0x6e5   :  { %v522_v46 = vpop.permute.xlu0 %521 }
 0x6e6   :  { %v524_v47 = vmul.f32 %v1854_v45, %v522_v46  ;;  %v36_v46 = vld [vmem:[%s2400_s0 + $0x38] sm:$0xff] }
 0x6e8   :  { %526 = vrot.lane.b32.xlu1 %v524_v47, %s1940_s26 }
 0x75a   :  { %v527_v48 = vpop.permute.xlu1 %526 }
 0x75b   :  { %v529_v49 = vadd.f32 %v527_v48, %v187_v35 }
 0x75d   :  { %1855 = vtanh.f32 %v529_v49 }
 0x767   :  { %v1856_v50 = vpop.eup %1855 }
 0x768   :  { %533 = vrot.lane.b32.xlu0 %v1856_v50, %s1941_s2 }
 0x7da   :  { %v534_v52 = vpop.permute.xlu0 %533 }
 0x7db   :  { %v536_v54 = vmul.f32 %v534_v52, %v531_v51 }
 0x7dd   :  { %v538_v55 = vadd.f32 %v537_v53, %v536_v54 }
 0x7df   :  { %540 = vrot.lane.b32.xlu1 %v538_v55, %s1941_s2 }
 0x851   :  { %v2143_v56 = vpop.permute.xlu1 %540 }
 0x852   :  { %1644 = vmatmul.mubr.msk.f32.vlgmr.msra.gmra.mrb[6].mxu1 %vm234_vm3, %v2143_v56 }
 0x853   :  { %1788 = vmatpush3.bf16.msra.mxu1 %v2008_v9  ;;  %1654 = vmatprep.mubr.msk.f32.mxu1 %vm1937_vm0, %v1938_v8 }
 0x854   :  { %1789 = vmatprep.subr.bf16.mxu1 %v1936_v3 }
 0x857   :  { %1791 = vmatpush3.bf16.msra.mxu1 %v2023_v15 }
 0x858   :  { %1798 = vmatprep.subr.bf16.mxu1 %v1936_v3 }
 0x925   :  { %v610_v57 = vpop.f32.mrb[6].mxu1 }
 0x926   :  { %v621_v58 = vadd.f32 %v2085_v40, %v610_v57  ;;  %v1645_v59 = vpop.f32.mrb[7].mxu1  ;;  %v614_v62 = vadd.f32 %v610_v57, %v225_v61 }
 0x928   :  { %623 = vrot.lane.b32.xlu0 %v621_v58, %s1940_s26  ;;  %v1444_v63 = vmul.f32 -1.442695, %v614_v62 }
 0x92a   :  { %1857 = vpow2.f32 %v1444_v63 }
 0x934   :  { %v1858_v1 = vpop.eup %1857 }
 0x935   :  { %v618_v2 = vadd.f32 1.0, %v1858_v1 }
 0x937   :  { %1859 = vrcp.f32 %v618_v2 }
 0x941   :  { %v1860_v4 = vpop.eup %1859 }
 0x942   :  { %v633_v13 = vsub.f32 1.0, %v1860_v4  ;;  %v639_v16 = vmul.f32 %v1860_v4, %v538_v55 }
 0x99a   :  { %v624_v5 = vpop.permute.xlu0 %623 }
 0x99b   :  { %v626_v6 = vmul.f32 %v1860_v4, %v624_v5  ;;  %v1049_v5 = vld [vmem:[%s2405_s5] sm:$0xff] }
 0x99d   :  { %628 = vrot.lane.b32.xlu1 %v626_v6, %s1940_s26  ;;  %v1050_v6 = vld [vmem:[%s2405_s5 + $0x8] sm:$0xff] }
 0xa0f   :  { %v629_v7 = vpop.permute.xlu1 %628 }
 0xa10   :  { %v631_v10 = vadd.f32 %v629_v7, %v192_v60  ;;  %v1810_v7 = vpack.c.bf16 %v1050_v6, %v1049_v5 }
 0xa12   :  { %1861 = vtanh.f32 %v631_v10 }
 0xa1c   :  { %v1862_v11 = vpop.eup %1861 }
 0xa1d   :  { %635 = vrot.lane.b32.xlu0 %v1862_v11, %s1941_s2 }
 0xa21   :  { %52 = vperm.xlu0 %1837, %v33_v12  }
 0xa8f   :  { %v636_v14 = vpop.permute.xlu0 %635 }
 0xa90   :  { %v638_v17 = vmul.f32 %v636_v14, %v633_v13 }
 0xa92   :  { %v640_v18 = vadd.f32 %v639_v16, %v638_v17  ;;  %v1051_v17 = vld [vmem:[%s2405_s5 + $0x10] sm:$0xff] }
 0xa94   :  { %642 = vrot.lane.b32.xlu1 %v640_v18, %s1941_s2 }
 0xa98   :  { %55 = vperm.xlu1 %1838, %v34_v19  }
 0xaa0   :  { %v53_v20 = vpop.permute.xlu0 %52 }
 0xaa1   :  { %vm67_vm6 = vcmp.eq.s32.totalorder %v2072_v36, %v53_v20 }
 0xaa2   :  { %1596 = vmatprep.mubr.msk.f32.mxu0 %vm67_vm6, %v1939_v38 }
 0xb06   :  { %v2168_v21 = vpop.permute.xlu1 %642 }
 0xb07   :  { %1655 = vmatmul.mubr.msk.f32.vlgmr.msra.gmra.mrb[8].mxu1 %vm234_vm3, %v2168_v21 }
 0xb08   :  { %1800 = vmatpush3.bf16.msra.mxu1 %v2008_v9  ;;  %1676 = vmatprep.mubr.msk.f32.mxu1 %vm1937_vm0, %v1938_v8 }
 0xb09   :  { %1801 = vmatprep.subr.bf16.mxu1 %v1936_v3 }
 0xb0c   :  { %1803 = vmatpush3.bf16.msra.mxu1 %v2023_v15 }
 0xb0d   :  { %1811 = vmatprep.subr.bf16.mxu1 %v1810_v7 }
 0xb17   :  { %v56_v22 = vpop.permute.xlu1 %55 }
 0xb18   :  { %vm68_vm7 = vcmp.eq.s32.totalorder %v2072_v36, %v56_v22 }
 0xb19   :  { %1597 = vmatmul.mubr.msk.f32.gmra.mrb[4].mxu0 %vm68_vm7, %v1939_v38 }
 0xbda   :  { %v712_v23 = vpop.f32.mrb[8].mxu1 }
 0xbdb   :  { %v723_v24 = vadd.f32 %v2085_v40, %v712_v23  ;;  %v1656_v25 = vpop.f32.mrb[9].mxu1 }
 0xbdd   :  { %725 = vrot.lane.b32.xlu0 %v723_v24, %s1940_s26 }
 0xbec   :  { %v1598_v26 = vpop.f32.mrb[4].mxu0 }
 0xbed   :  { %v196_v27 = vpop.f32.mrb[5].mxu0  ;;  %v202_v60 = vadd.f32 %v1598_v26, %v2092_v44 }
 0xbee   :  { %v197_v29 = vadd.f32 %v2092_v44, %v196_v27 }
 0xbf0   :  { %v226_v30 = vadd.f32 %v2085_v40, %v197_v29 }
 0xbf2   :  { %v716_v31 = vadd.f32 %v712_v23, %v226_v30 }
 0xbf4   :  { %v1446_v32 = vmul.f32 -1.442695, %v716_v31 }
 0xbf6   :  { %1863 = vpow2.f32 %v1446_v32 }
 0xc00   :  { %v1864_v33 = vpop.eup %1863 }
 0xc01   :  { %v720_v34 = vadd.f32 1.0, %v1864_v33 }
 0xc03   :  { %1865 = vrcp.f32 %v720_v34 }
 0xc0d   :  { %v1866_v35 = vpop.eup %1865 }
 0xc0e   :  { %v735_v48 = vsub.f32 1.0, %v1866_v35  ;;  %v741_v50 = vmul.f32 %v1866_v35, %v640_v18  ;;  %v1052_v18 = vld [vmem:[%s2405_s5 + $0x18] sm:$0xff] }
 0xc0f   :  { %v1814_v19 = vpack.c.bf16 %v1052_v18, %v1051_v17 }
 0xc4f   :  { %v726_v37 = vpop.permute.xlu0 %725 }
 0xc50   :  { %v728_v39 = vmul.f32 %v1866_v35, %v726_v37 }
 0xc52   :  { %730 = vrot.lane.b32.xlu1 %v728_v39, %s1940_s26 }
 0xc56   :  { %58 = vperm.xlu1 %1838, %v35_v41  }
 0xcc4   :  { %v731_v42 = vpop.permute.xlu1 %730 }
 0xcc5   :  { %v733_v43 = vadd.f32 %v731_v42, %v197_v29  ;;  %v1178_v42 = vld [vmem:[%s2406_s7] sm:$0xff] }
 0xcc7   :  { %1867 = vtanh.f32 %v733_v43  ;;  %v1179_v43 = vld [vmem:[%s2406_s7 + $0x8] sm:$0xff] }
 0xcd1   :  { %v1868_v45 = vpop.eup %1867 }
 0xcd2   :  { %737 = vrot.lane.b32.xlu0 %v1868_v45, %s1941_s2  ;;  %v1818_v45 = vpack.c.bf16 %v1179_v43, %v1178_v42 }
 0xcd5   :  { %v59_v47 = vpop.permute.xlu1 %58 }
 0xcd6   :  { %vm69_vm8 = vcmp.eq.s32.totalorder %v2072_v36, %v59_v47  ;;  %61 = vperm.xlu0 %1837, %v36_v46   ;;  %v1180_v47 = vld [vmem:[%s2406_s7 + $0x10] sm:$0xff] }
 0xcd7   :  { %1599 = vmatprep.mubr.msk.f32.mxu0 %vm69_vm8, %v1939_v38 }
 0xd44   :  { %v738_v49 = vpop.permute.xlu0 %737 }
 0xd45   :  { %v740_v51 = vmul.f32 %v738_v49, %v735_v48  ;;  %v1181_v48 = vld [vmem:[%s2406_s7 + $0x18] sm:$0xff] }
 0xd46   :  { %v1822_v49 = vpack.c.bf16 %v1181_v48, %v1180_v47 }
 0xd47   :  { %v742_v52 = vadd.f32 %v741_v50, %v740_v51 }
 0xd49   :  { %744 = vrot.lane.b32.xlu1 %v742_v52, %s1941_s2 }
 0xd55   :  { %v62_v53 = vpop.permute.xlu0 %61 }
 0xd56   :  { %vm70_vm9 = vcmp.eq.s32.totalorder %v2072_v36, %v62_v53 }
 0xd57   :  { %1600 = vmatmul.mubr.msk.f32.gmra.mrb[6].mxu0 %vm70_vm9, %v1939_v38 }
 0xd58   :  { %1665 = vmatprep.mubr.msk.f32.mxu0 %vm1937_vm0, %v1938_v8 }
 0xdbb   :  { %v745_v54 = vpop.permute.xlu1 %744 }
 0xdbc   :  { %1666 = vmatmul.mubr.msk.f32.vlgmr.msra.gmra.mrb[8].mxu0 %vm234_vm3, %v745_v54 }
 0xdbd   :  { %1806 = vmatpush3.bf16.msra.mxu0 %v2008_v9  ;;  %1687 = vmatprep.mubr.msk.f32.mxu0 %vm1937_vm0, %v1938_v8  ;;  %v227_v9 = vadd.f32 %v2085_v40, %v202_v60 }
 0xdbe   :  { %1807 = vmatprep.subr.bf16.mxu0 %v1936_v3 }
 0xdc1   :  { %1809 = vmatpush3.bf16.msra.mxu0 %v2023_v15 }
 0xdc2   :  { %1819 = vmatprep.subr.bf16.mxu0 %v1818_v45 }
 0xe2a   :  { %v2204_v55 = vpop.f32.mrb[6].mxu0 }
 0xe2b   :  { %v206_v57 = vpop.f32.mrb[7].mxu0 }
 0xe8f   :  { %v814_v58 = vpop.f32.mrb[8].mxu0 }
 0xe90   :  { %v825_v38 = vadd.f32 %v2085_v40, %v814_v58  ;;  %v1667_v59 = vpop.f32.mrb[9].mxu0  ;;  %v818_v61 = vadd.f32 %v814_v58, %v227_v9 }
 0xe92   :  { %827 = vrot.lane.b32.xlu0 %v825_v38, %s1940_s26  ;;  %v1448_v62 = vmul.f32 -1.442695, %v818_v61 }
 0xe94   :  { %1869 = vpow2.f32 %v1448_v62 }
 0xe9e   :  { %v1870_v8 = vpop.eup %1869 }
 0xe9f   :  { %v822_v3 = vadd.f32 1.0, %v1870_v8 }
 0xea1   :  { %1871 = vrcp.f32 %v822_v3 }
 0xeab   :  { %v1872_v15 = vpop.eup %1871 }
 0xeac   :  { %v837_v11 = vsub.f32 1.0, %v1872_v15  ;;  %v843_v13 = vmul.f32 %v1872_v15, %v742_v52 }
 0xf04   :  { %v828_v63 = vpop.permute.xlu0 %827 }
 0xf05   :  { %v830_v1 = vmul.f32 %v1872_v15, %v828_v63 }
 0xf07   :  { %832 = vrot.lane.b32.xlu1 %v830_v1, %s1940_s26 }
 0xf79   :  { %v833_v2 = vpop.permute.xlu1 %832 }
 0xf7a   :  { %v835_v4 = vadd.f32 %v833_v2, %v202_v60 }
 0xf7c   :  { %1873 = vtanh.f32 %v835_v4 }
 0xf86   :  { %v1874_v10 = vpop.eup %1873 }
 0xf87   :  { %839 = vrot.lane.b32.xlu0 %v1874_v10, %s1941_s2 }
 0xff9   :  { %v840_v12 = vpop.permute.xlu0 %839 }
 0xffa   :  { %v842_v14 = vmul.f32 %v840_v12, %v837_v11 }
 0xffc   :  { %v844_v16 = vadd.f32 %v843_v13, %v842_v14 }
 0xffe   :  { %846 = vrot.lane.b32.xlu1 %v844_v16, %s1941_s2 }
0x1070   :  { %v847_v20 = vpop.permute.xlu1 %846 }
0x1071   :  { %1677 = vmatmul.mubr.msk.f32.vlgmr.msra.gmra.mrb[10].mxu1 %vm234_vm3, %v847_v20 }
0x1072   :  { %1813 = vmatpush3.bf16.msra.mxu1 %v1810_v7  ;;  %1698 = vmatprep.mubr.msk.f32.mxu1 %vm234_vm3, %v2099_v0 }
0x1073   :  { %1815 = vmatprep.subr.bf16.mxu1 %v1814_v19 }
0x1076   :  { %1817 = vmatpush3.bf16.msra.mxu1 %v1814_v19 }
0x1077   :  { %1826 = vmatprep.subr.bf16.mxu1 %v1818_v45 }
0x1079   :  { %1699 = vmatmul.mubr.msk.f32.vlgmr.msra.gmra.mrb[12].mxu1 %vm234_vm3, %v2124_v28 }
0x107a   :  { %1701 = vmatprep.mubr.msk.f32.mxu1 %vm234_vm3, %v2143_v56  ;;  %v207_v56 = vadd.f32 %v2092_v44, %v206_v57  ;;  %1828 = vmatpush3.bf16.msra.mxu1 %v1818_v45  ;;  %v2261_v57 = vld [vmem:[%s2407_s6] ss:$0 sm:$0xff] }
0x107b   :  { %1827 = vmatprep.subr.bf16.mxu1 %v1822_v49 }
0x107d   :  { %1702 = vmatmul.mubr.msk.f32.gmra.mrb[14].mxu1 %vm234_vm3, %v2168_v21  ;;  %v228_v21 = vadd.f32 %v2085_v40, %v207_v56 }
0x107e   :  { %1704 = vmatprep.mubr.msk.f32.mxu1 %vm234_vm3, %v745_v54  ;;  %1829 = vmatpush3.bf16.msra.mxu1 %v1822_v49 }
0x1081   :  { %1705 = vmatmul.mubr.msk.f32.gmra.mrb[16].mxu1 %vm234_vm3, %v847_v20 }
0x1144   :  { %v916_v22 = vpop.f32.mrb[10].mxu1 }
0x1145   :  { %v927_v23 = vadd.f32 %v2085_v40, %v916_v22  ;;  %v1678_v24 = vpop.f32.mrb[11].mxu1  ;;  %v920_v30 = vadd.f32 %v916_v22, %v228_v21 }
0x1147   :  { %929 = vrot.lane.b32.xlu0 %v927_v23, %s1940_s26  ;;  %v1450_v31 = vmul.f32 -1.442695, %v920_v30 }
0x1149   :  { %1875 = vpow2.f32 %v1450_v31 }
0x114c   :  { %v1700_v0 = vpop.f32.mrb[12].mxu1 }
0x114d   :  { %v1131_v25 = vpop.f32.mrb[13].mxu1  ;;  %v1137_v38 = vadd.f32 %v1700_v0, %v2261_v57 }
0x114e   :  { %v1132_v58 = vadd.f32 %v2261_v57, %v1131_v25 }
0x1150   :  { %v1703_v26 = vpop.f32.mrb[14].mxu1 }
0x1151   :  { %v1141_v28 = vpop.f32.mrb[15].mxu1  ;;  %v1147_v60 = vadd.f32 %v1703_v26, %v2261_v57 }
0x1152   :  { %v1142_v59 = vadd.f32 %v2261_v57, %v1141_v28 }
0x1153   :  { %v1876_v32 = vpop.eup %1875 }
0x1154   :  { %v1706_v27 = vpop.f32.mrb[16].mxu1  ;;  %v924_v33 = vadd.f32 1.0, %v1876_v32 }
0x1155   :  { %v1151_v29 = vpop.f32.mrb[17].mxu1  ;;  %v1157_v8 = vadd.f32 %v1706_v27, %v2261_v57 }
0x1156   :  { %1877 = vrcp.f32 %v924_v33  ;;  %v1152_v9 = vadd.f32 %v2261_v57, %v1151_v29 }
0x1160   :  { %v1878_v34 = vpop.eup %1877 }
0x1161   :  { %v939_v50 = vsub.f32 1.0, %v1878_v34  ;;  %v945_v52 = vmul.f32 %v1878_v34, %v844_v16  ;;  %v212_v16 = vadd.f32 %v2204_v55, %v2092_v44 }
0x1163   :  { %v229_v17 = vadd.f32 %v2085_v40, %v212_v16 }
0x11b9   :  { %v930_v35 = vpop.permute.xlu0 %929 }
0x11ba   :  { %v932_v37 = vmul.f32 %v1878_v34, %v930_v35 }
0x11bc   :  { %934 = vrot.lane.b32.xlu1 %v932_v37, %s1940_s26 }
0x122e   :  { %v935_v39 = vpop.permute.xlu1 %934 }
0x122f   :  { %v937_v41 = vadd.f32 %v935_v39, %v207_v56 }
0x1231   :  { %1879 = vtanh.f32 %v937_v41 }
0x1232   :  { %1881 = vtanh.f32 %v1132_v58 }
0x1233   :  { %1883 = vtanh.f32 %v1137_v38 }
0x1234   :  { %1885 = vtanh.f32 %v1142_v59 }
0x1235   :  { %1887 = vtanh.f32 %v1147_v60 }
0x1236   :  { %1889 = vtanh.f32 %v1152_v9 }
0x1237   :  { %1891 = vtanh.f32 %v1157_v8 }
0x123b   :  { %v1880_v46 = vpop.eup %1879 }
0x123c   :  { %941 = vrot.lane.b32.xlu0 %v1880_v46, %s1941_s2  ;;  %v1882_v62 = vpop.eup %1881 }
0x123d   :  { %v1884_v3 = vpop.eup %1883 }
0x123e   :  { %v1886_v15 = vpop.eup %1885 }
0x123f   :  { %v1888_v63 = vpop.eup %1887 }
0x1240   :  { %v1890_v1 = vpop.eup %1889 }
0x1241   :  { %v1892_v2 = vpop.eup %1891 }
0x12ae   :  { %v942_v51 = vpop.permute.xlu0 %941 }
0x12af   :  { %v944_v53 = vmul.f32 %v942_v51, %v939_v50 }
0x12b1   :  { %v2254_v54 = vadd.f32 %v945_v52, %v944_v53 }
0x12b3   :  { %948 = vrot.lane.b32.xlu1 %v2254_v54, %s1941_s2 }
0x1325   :  { %v949_v61 = vpop.permute.xlu1 %948 }
0x1326   :  { %1688 = vmatmul.mubr.msk.f32.vlgmr.msra.gmra.mrb[10].mxu0 %vm234_vm3, %v949_v61  ;;  %1707 = vmatprep.mubr.msk.f32.mxu1 %vm234_vm3, %v949_v61 }
0x1327   :  { %1821 = vmatpush3.bf16.msra.mxu0 %v1818_v45  ;;  %1718 = vmatprep.mubr.msk.f32.mxu0 %vm234_vm3, %v1882_v62 }
0x1328   :  { %1823 = vmatprep.subr.bf16.mxu0 %v1822_v49 }
0x132b   :  { %1825 = vmatpush3.bf16.msra.mxu0 %v1822_v49 }
0x132e   :  { %1719 = vmatmul.mubr.msk.f32.vlgmr.msra.gmra.mrb[12].mxu0 %vm234_vm3, %v1884_v3 }
0x132f   :  { %1721 = vmatprep.mubr.msk.f32.mxu0 %vm234_vm3, %v1886_v15 }
0x1332   :  { %1722 = vmatmul.mubr.msk.f32.gmra.mrb[14].mxu0 %vm234_vm3, %v1888_v63 }
0x1333   :  { %1724 = vmatprep.mubr.msk.f32.mxu0 %vm234_vm3, %v1890_v1 }
0x1336   :  { %1725 = vmatmul.mubr.msk.f32.gmra.mrb[16].mxu0 %vm234_vm3, %v1892_v2 }
0x13f9   :  { %v1018_v4 = vpop.f32.mrb[10].mxu0 }
0x13fa   :  { %v1029_v5 = vadd.f32 %v2085_v40, %v1018_v4  ;;  %v1689_v6 = vpop.f32.mrb[11].mxu0  ;;  %v1022_v18 = vadd.f32 %v1018_v4, %v229_v17 }
0x13fc   :  { %1031 = vrot.lane.b32.xlu0 %v1029_v5, %s1940_s26  ;;  %v1452_v19 = vmul.f32 -1.442695, %v1022_v18 }
0x13fe   :  { %1893 = vpow2.f32 %v1452_v19 }
0x1401   :  { %v1720_v7 = vpop.f32.mrb[12].mxu0 }
0x1402   :  { %v1272_v10 = vpop.f32.mrb[13].mxu0  ;;  %v2309_v32 = vsel %vm1311_vm10, -inf, %v1720_v7 }
0x1403   :  { %v2287_v40 = vsel %vm1311_vm10, -inf, %v1272_v10 }
0x1405   :  { %v1723_v11 = vpop.f32.mrb[14].mxu0 }
0x1406   :  { %v1282_v12 = vpop.f32.mrb[15].mxu0  ;;  %v2297_v55 = vsel %vm1311_vm10, -inf, %v1723_v11 }
0x1407   :  { %v2292_v44 = vsel %vm1311_vm10, -inf, %v1282_v12 }
0x1408   :  { %v1894_v20 = vpop.eup %1893 }
0x1409   :  { %v1726_v13 = vpop.f32.mrb[16].mxu0  ;;  %v1026_v22 = vadd.f32 1.0, %v1894_v20 }
0x140a   :  { %v1292_v14 = vpop.f32.mrb[17].mxu0  ;;  %v2302_v27 = vsel %vm1311_vm10, -inf, %v1726_v13 }
0x140b   :  { %1895 = vrcp.f32 %v1026_v22  ;;  %v2314_v33 = vsel %vm1311_vm10, -inf, %v1292_v14 }
0x1415   :  { %v1896_v23 = vpop.eup %1895 }
0x1416   :  { %v1041_v29 = vsub.f32 1.0, %v1896_v23  ;;  %v1047_v21 = vmul.f32 %v1896_v23, %v2254_v54 }
0x146e   :  { %v1032_v24 = vpop.permute.xlu0 %1031 }
0x146f   :  { %v1034_v0 = vmul.f32 %v1896_v23, %v1032_v24 }
0x1471   :  { %1036 = vrot.lane.b32.xlu1 %v1034_v0, %s1940_s26 }
0x14e3   :  { %v1037_v25 = vpop.permute.xlu1 %1036 }
0x14e4   :  { %v1039_v26 = vadd.f32 %v1037_v25, %v212_v16 }
0x14e6   :  { %1897 = vtanh.f32 %v1039_v26 }
0x14f0   :  { %v1898_v28 = vpop.eup %1897 }
0x14f1   :  { %1043 = vrot.lane.b32.xlu0 %v1898_v28, %s1941_s2 }
0x1510   :  { %1320 = vmax.xlane.f32.xlu0 %v2287_v40 }
0x1514   :  { %1324 = vmax.xlane.f32.xlu0 %v2292_v44 }
0x1518   :  { %1326 = vmax.xlane.f32.xlu0 %v2297_v55 }
0x151c   :  { %1330 = vmax.xlane.f32.xlu0 %v2302_v27 }
0x1563   :  { %v1044_v56 = vpop.permute.xlu0 %1043 }
0x1564   :  { %v1046_v30 = vmul.f32 %v1044_v56, %v1041_v29 }
0x1566   :  { %v1048_v31 = vadd.f32 %v1047_v21, %v1046_v30 }
0x1568   :  { %1061 = vrot.lane.b32.xlu1 %v1048_v31, %s1941_s2 }
0x158c   :  { %1322 = vmax.xlane.f32.xlu1 %v2309_v32 }
0x1590   :  { %1328 = vmax.xlane.f32.xlu1 %v2314_v33 }
0x159d   :  { %v2322_v45 = vpop.xlane.xlu0 %1320 }
0x159e   :  { %v1336_v50 = vsub.f32 %v2287_v40, %v2322_v45 }
0x15a0   :  { %v1344_v53 = vmul.f32 1.442695, %v1336_v50 }
0x15a1   :  { %v2324_v46 = vpop.xlane.xlu0 %1324 }
0x15a2   :  { %v1338_v54 = vsub.f32 %v2292_v44, %v2324_v46 }
0x15a4   :  { %v1348_v60 = vmul.f32 1.442695, %v1338_v54 }
0x15a5   :  { %v2328_v48 = vpop.xlane.xlu0 %1326 }
0x15a6   :  { %v1339_v51 = vsub.f32 %v2297_v55, %v2328_v48 }
0x15a8   :  { %v1350_v38 = vmul.f32 1.442695, %v1339_v51 }
0x15da   :  { %v1062_v34 = vpop.permute.xlu1 %1061 }
0x15db   :  { %1708 = vmatmul.mubr.msk.f32.gmra.mrb[18].mxu1 %vm234_vm3, %v1062_v34 }
0x1619   :  { %v2326_v47 = vpop.xlane.xlu1 %1322 }
0x161a   :  { %v1337_v49 = vsub.f32 %v2309_v32, %v2326_v47 }
0x161c   :  { %v1346_v52 = vmul.f32 1.442695, %v1337_v49 }
0x161d   :  { %v2340_v58 = vpop.xlane.xlu1 %1328 }
0x161e   :  { %v1340_v9 = vsub.f32 %v2314_v33, %v2340_v58 }
0x1620   :  { %v1352_v62 = vmul.f32 1.442695, %v1340_v9 }
0x16ae   :  { %v1709_v35 = vpop.f32.mrb[18].mxu1 }
0x16af   :  { %v1167_v37 = vadd.f32 %v1709_v35, %v2261_v57  ;;  %v1161_v39 = vpop.f32.mrb[19].mxu1 }
0x16b0   :  { %v1162_v41 = vadd.f32 %v2261_v57, %v1161_v39  ;;  %v2338_v57 = vpop.xlane.xlu0 %1330 }
0x16b1   :  { %v1341_v59 = vsub.f32 %v2302_v27, %v2338_v57 }
0x16b2   :  { %1899 = vtanh.f32 %v1162_v41 }
0x16b3   :  { %1901 = vtanh.f32 %v1167_v37  ;;  %v1354_v61 = vmul.f32 1.442695, %v1341_v59 }
0x16b4   :  { %1903 = vpow2.f32 %v1346_v52 }
0x16b5   :  { %1905 = vpow2.f32 %v1344_v53 }
0x16b6   :  { %1907 = vpow2.f32 %v1350_v38 }
0x16b7   :  { %1909 = vpow2.f32 %v1348_v60 }
0x16b8   :  { %1911 = vpow2.f32 %v1354_v61 }
0x16b9   :  { %1913 = vpow2.f32 %v1352_v62 }
0x16bc   :  { %v1900_v42 = vpop.eup %1899 }
0x16bd   :  { %v1902_v43 = vpop.eup %1901  ;;  %1727 = vmatprep.mubr.msk.f32.mxu1 %vm234_vm3, %v1900_v42 }
0x16be   :  { %1728 = vmatmul.mubr.msk.f32.vlgmr.msra.gmra.mrb[20].mxu1 %vm234_vm3, %v1902_v43  ;;  %v1904_v1 = vpop.eup %1903 }
0x16bf   :  { %v1906_v2 = vpop.eup %1905 }
0x16c0   :  { %v1908_v4 = vpop.eup %1907 }
0x16c1   :  { %v1910_v5 = vpop.eup %1909 }
0x16c2   :  { %v1912_v6 = vpop.eup %1911 }
0x16c3   :  { %v1914_v7 = vpop.eup %1913 }
0x1791   :  { %v1729_v8 = vpop.f32.mrb[20].mxu1 }
0x1792   :  { %v2348_v3 = vsel %vm1311_vm10, -inf, %v1729_v8  ;;  %v1302_v15 = vpop.f32.mrb[21].mxu1 }
0x1793   :  { %v2352_v63 = vsel %vm1311_vm10, -inf, %v1302_v15  ;;  %1334 = vmax.xlane.f32.xlu0 %v2348_v3 }
0x1794   :  { %1332 = vmax.xlane.f32.xlu1 %v2352_v63 }
0x1797   :  { %1362 = vadd.xlane.f32.xlu0 %v1904_v1 }
0x1798   :  { %1360 = vadd.xlane.f32.xlu1 %v1906_v2 }
0x179b   :  { %1366 = vadd.xlane.f32.xlu0 %v1908_v4 }
0x179c   :  { %1364 = vadd.xlane.f32.xlu1 %v1910_v5 }
0x179f   :  { %1370 = vadd.xlane.f32.xlu0 %v1912_v6 }
0x17a0   :  { %1368 = vadd.xlane.f32.xlu1 %v1914_v7 }
0x1820   :  { %v2356_v36 = vpop.xlane.xlu0 %1334 }
0x1821   :  { %v1343_v10 = vsub.f32 %v2348_v3, %v2356_v36  ;;  %v1333_v11 = vpop.xlane.xlu1 %1332 }
0x1822   :  { %v1342_v12 = vsub.f32 %v2352_v63, %v1333_v11 }
0x1823   :  { %v1358_v13 = vmul.f32 1.442695, %v1343_v10 }
0x1824   :  { %v1356_v14 = vmul.f32 1.442695, %v1342_v12  ;;  %v1363_v16 = vpop.xlane.xlu0 %1362 }
0x1825   :  { %1915 = vpow2.f32 %v1358_v13  ;;  %v1361_v17 = vpop.xlane.xlu1 %1360 }
0x1826   :  { %1917 = vpow2.f32 %v1356_v14 }
0x1827   :  { %1919 = vlog2.f32 %v1363_v16 }
0x1828   :  { %1921 = vlog2.f32 %v1361_v17  ;;  %v1367_v18 = vpop.xlane.xlu0 %1366 }
0x1829   :  { %1923 = vlog2.f32 %v1367_v18  ;;  %v1365_v19 = vpop.xlane.xlu1 %1364 }
0x182a   :  { %1925 = vlog2.f32 %v1365_v19 }
0x182c   :  { %v1371_v20 = vpop.xlane.xlu0 %1370 }
0x182d   :  { %1927 = vlog2.f32 %v1371_v20  ;;  %v1369_v22 = vpop.xlane.xlu1 %1368 }
0x182e   :  { %1929 = vlog2.f32 %v1369_v22 }
0x182f   :  { %v1916_v23 = vpop.eup %1915 }
0x1830   :  { %v1918_v24 = vpop.eup %1917  ;;  %1374 = vadd.xlane.f32.xlu0 %v1916_v23 }
0x1831   :  { %v1920_v0 = vpop.eup %1919  ;;  %1372 = vadd.xlane.f32.xlu1 %v1918_v24 }
0x1832   :  { %v1922_v25 = vpop.eup %1921  ;;  %v1379_v26 = vmul.f32 0.6931472, %v1920_v0 }
0x1833   :  { %v1924_v28 = vpop.eup %1923  ;;  %v1377_v29 = vmul.f32 0.6931472, %v1922_v25 }
0x1834   :  { %v1926_v56 = vpop.eup %1925  ;;  %v1393_v21 = vadd.f32 %v1379_v26, %v2326_v47  ;;  %v1383_v30 = vmul.f32 0.6931472, %v1924_v28 }
0x1835   :  { %v1392_v31 = vadd.f32 %v1377_v29, %v2322_v45  ;;  %v1381_v34 = vmul.f32 0.6931472, %v1926_v56 }
0x1836   :  { %v1401_v35 = vsub.f32 %v2309_v32, %v1393_v21  ;;  %v1395_v37 = vadd.f32 %v1383_v30, %v2328_v48 }
0x1837   :  { %v1928_v39 = vpop.eup %1927  ;;  %v1400_v41 = vsub.f32 %v2287_v40, %v1392_v31  ;;  %v1394_v42 = vadd.f32 %v1381_v34, %v2324_v46 }
0x1838   :  { %v1930_v43 = vpop.eup %1929  ;;  %1409 = vst [vmem:[%s2408_s8 + $0x8] sm:$0xff] %v1401_v35  ;;  %v1403_v47 = vsub.f32 %v2297_v55, %v1395_v37  ;;  %v1387_v49 = vmul.f32 0.6931472, %v1928_v39 }
0x1839   :  { %1408 = vst [vmem:[%s2408_s8] sm:$0xff] %v1400_v41  ;;  %v1402_v32 = vsub.f32 %v2292_v44, %v1394_v42  ;;  %v1385_v45 = vmul.f32 0.6931472, %v1930_v43 }
0x183a   :  { %1411 = vst [vmem:[%s2408_s8 + $0x18] sm:$0xff] %v1403_v47  ;;  %v1397_v40 = vadd.f32 %v1387_v49, %v2338_v57 }
0x183b   :  { %1410 = vst [vmem:[%s2408_s8 + $0x10] sm:$0xff] %v1402_v32  ;;  %v1396_v55 = vadd.f32 %v1385_v45, %v2340_v58 }
0x183c   :  { %v1405_v46 = vsub.f32 %v2302_v27, %v1397_v40 }
0x183d   :  { %v1404_v48 = vsub.f32 %v2314_v33, %v1396_v55 }
0x183e   :  { %1413 = vst [vmem:[%s2408_s8 + $0x28] sm:$0xff] %v1405_v46 }
0x183f   :  { %1412 = vst [vmem:[%s2408_s8 + $0x20] sm:$0xff] %v1404_v48 }
0x18bd   :  { %v1375_v44 = vpop.xlane.xlu0 %1374 }
0x18be   :  { %1931 = vlog2.f32 %v1375_v44  ;;  %v1373_v50 = vpop.xlane.xlu1 %1372 }
0x18bf   :  { %1933 = vlog2.f32 %v1373_v50 }
0x18c8   :  { %v1932_v51 = vpop.eup %1931 }
0x18c9   :  { %v1934_v52 = vpop.eup %1933  ;;  %v1391_v53 = vmul.f32 0.6931472, %v1932_v51 }
0x18ca   :  { %v1389_v54 = vmul.f32 0.6931472, %v1934_v52 }
0x18cb   :  { %v1399_v27 = vadd.f32 %v1391_v53, %v2356_v36 }
0x18cc   :  { %v1398_v57 = vadd.f32 %v1389_v54, %v1333_v11 }
0x18cd   :  { %v1407_v33 = vsub.f32 %v2348_v3, %v1399_v27 }
0x18ce   :  { %v1406_v58 = vsub.f32 %v2352_v63, %v1398_v57 }
0x18cf   :  { %1415 = vst [vmem:[%s2408_s8 + $0x38] sm:$0xff] %v1407_v33 }
0x18d0   :  { %1414 = vst [vmem:[%s2408_s8 + $0x30] sm:$0xff] %v1406_v58 }

</bundles_post_ra>
